<compile_context>
chip_gen: v6e
topology: v6e:2x2x1
jax: 0.10.0
libtpu: 0.0.40
codegen_flags: <defaults>
</compile_context>

<pallas_src>
import functools

import jax
import jax.numpy as jnp
from jax.experimental import pallas as pl
from jax.experimental.pallas import tpu as pltpu


# --------------------------- fused kernel ------------------------------------
def _fused_kernel(inv_hw, x_ref, w1_ref, b1_ref, w2_ref, b2_ref,
                  x1_ref, out_ref, acc_ref):
    # Grid = (N, HW_tiles); batch dim is squeezed out of x/x1/out blocks.
    #   x_ref  : (Cin, THW)    input tile (lane axis = HW)
    #   w1_ref : (Cout, Cin)   1x1-conv weight
    #   b1_ref : (Cout, 1)     conv bias
    #   w2_ref : (Cout, K)     classifier weight
    #   b2_ref : (1, K)        classifier bias
    #   x1_ref : (Cout, THW)   conv+ReLU output tile (already NCHW layout)
    #   out_ref: (1, K)        branch output for this sample
    #   acc_ref: (Cout, 1)     running per-channel sums (VMEM scratch)
    t = pl.program_id(1)

    @pl.when(t == 0)
    def _():
        acc_ref[...] = jnp.zeros_like(acc_ref)

    x = x_ref[...]                                   # (Cin, THW), f32
    w1 = w1_ref[...]                                 # (Cout, Cin)
    cin = x.shape[0]

    # Pointwise conv as VPU broadcast-FMA over the lane-dense HW axis
    # (no MXU: a 4x8 problem would waste the whole systolic array).
    y = w1[:, 0:1] * x[0:1, :]                       # (Cout, THW)
    for ci in range(1, cin):
        y = y + w1[:, ci:ci + 1] * x[ci:ci + 1, :]
    y = jnp.maximum(y + b1_ref[...], 0.0)            # bias + ReLU
    x1_ref[...] = y.astype(x1_ref.dtype)

    # Fused global-average-pool: accumulate channel sums (lane reduce -> XLU).
    acc_ref[...] += jnp.sum(y, axis=1, keepdims=True)

    # Epilogue on the last HW tile: mean + linear classifier + bias.
    @pl.when(t == pl.num_programs(1) - 1)
    def _():
        pooled = acc_ref[...] * inv_hw               # (Cout, 1)  sum * 1/HW
        contrib = pooled * w2_ref[...]               # (Cout, K)  broadcast FMA
        out_ref[...] = (jnp.sum(contrib, axis=0, keepdims=True)
                        + b2_ref[...]).astype(out_ref.dtype)


def _pick_hw_tile(hw, target=512):
    """Largest multiple of 128 <= target that divides HW; else one full tile."""
    if hw % 128 != 0:
        return hw
    t = min(target, hw)
    t -= t % 128
    while hw % t != 0:
        t -= 128
    return t


# ------------------------------ BranchPoint ----------------------------------
def branch_point_forward(x_nchw, params, *, hw_tile_target=512):
    """Returns (x1_nchw, branch_output).

    x1 is the value BranchPoint.forward returns; branch_output is what it
    stashes in self.output.
    """
    N, Cin, H, W = x_nchw.shape
    HW = H * W
    w1, b1, w2, b2 = params["w1"], params["b1"], params["w2"], params["b2"]
    Cout = w1.shape[0]
    K = w2.shape[1]

    THW = _pick_hw_tile(HW, hw_tile_target)
    HT = HW // THW

    # Free reshapes only — no HBM transpose passes.
    x3 = x_nchw.reshape(N, Cin, HW).astype(jnp.float32)
    b1c = b1.reshape(Cout, 1).astype(jnp.float32)
    b2r = b2.reshape(1, K).astype(jnp.float32)

    kernel = functools.partial(_fused_kernel, 1.0 / float(HW))

    x1_3, out3 = pl.pallas_call(
        kernel,
        out_shape=(
            jax.ShapeDtypeStruct((N, Cout, HW), jnp.float32),   # x1 (NC,HW)
            jax.ShapeDtypeStruct((N, 1, K), jnp.float32),       # branch output
        ),
        grid_spec=pltpu.PrefetchScalarGridSpec(
            num_scalar_prefetch=0,
            grid=(N, HT),
            in_specs=[
                pl.BlockSpec((None, Cin, THW), lambda n, t: (n, 0, t)),
                pl.BlockSpec((Cout, Cin), lambda n, t: (0, 0)),
                pl.BlockSpec((Cout, 1), lambda n, t: (0, 0)),
                pl.BlockSpec((Cout, K), lambda n, t: (0, 0)),
                pl.BlockSpec((1, K), lambda n, t: (0, 0)),
            ],
            out_specs=[
                pl.BlockSpec((None, Cout, THW), lambda n, t: (n, 0, t)),
                pl.BlockSpec((None, 1, K), lambda n, t: (n, 0, 0)),
            ],
            scratch_shapes=[pltpu.VMEM((Cout, 1), jnp.float32)],
        ),
        compiler_params=pltpu.CompilerParams(
            # batch axis parallel (v7x 2 TCs); HW axis is the fused pooling
            # reduction -> arbitrary. Tiles are tiny; 32 MiB is v7x-safe.
            dimension_semantics=("parallel", "arbitrary"),
            vmem_limit_bytes=32 * 1024 * 1024,
        ),
    )(x3, w1.astype(jnp.float32), b1c, w2.astype(jnp.float32), b2r)

    x1_nchw = x1_3.reshape(N, Cout, H, W)      # free reshape, already NCHW
    branch_out = out3.reshape(N, K)
    return x1_nchw, branch_out


def make_params(Cin=4, Cout=8, num_classes=10):
    k = jax.random.PRNGKey(42)
    k1, k2, k3, k4 = jax.random.split(k, 4)
    return {
        "w1": jax.random.normal(k1, (Cout, Cin), jnp.float32) * 0.1,   # conv1x1
        "b1": jax.random.normal(k2, (Cout,), jnp.float32) * 0.1,
        "w2": jax.random.normal(k3, (Cout, num_classes), jnp.float32) * 0.1,
        "b2": jax.random.normal(k4, (num_classes,), jnp.float32) * 0.1,
    }


def _reference(x_nchw, params):
    # pure-JAX reference for sanity check
    w1, b1, w2, b2 = params["w1"], params["b1"], params["w2"], params["b2"]
    x1 = jnp.einsum("oc,nchw->nohw", w1, x_nchw) + b1[None, :, None, None]
    x1 = jnp.maximum(x1, 0.0)
    pooled = x1.mean(axis=(2, 3))
    out = pooled @ w2 + b2
    return x1, out


if __name__ == "__main__":
    N, Cin, H, W = 2, 4, 16, 16
    x = jax.random.normal(jax.random.PRNGKey(0), (N, Cin, H, W), jnp.float32)
    params = make_params(Cin=Cin, Cout=8, num_classes=10)

    x1, branch_out = branch_point_forward(x, params)
    jax.block_until_ready((x1, branch_out))

    x1_ref, out_ref = _reference(x, params)
    assert x1.shape == (N, 8, H, W)
    assert branch_out.shape == (N, 10)
    assert jnp.allclose(x1, x1_ref, atol=1e-5, rtol=1e-5)
    assert jnp.allclose(branch_out, out_ref, atol=1e-5, rtol=1e-5)

    print("KERNEL_OK")
</pallas_src>

<mosaic_0001>
module attributes {stable_mosaic.version = 11 : i64} {
  func.func @_fused_kernel(%arg0: i32, %arg1: i32, %arg2: memref<1x4x256xf32, #tpu.memory_space<vmem>>, %arg3: memref<8x4xf32, #tpu.memory_space<vmem>>, %arg4: memref<8x1xf32, #tpu.memory_space<vmem>>, %arg5: memref<8x10xf32, #tpu.memory_space<vmem>>, %arg6: memref<1x10xf32, #tpu.memory_space<vmem>>, %arg7: memref<1x8x256xf32, #tpu.memory_space<vmem>>, %arg8: memref<1x1x10xf32, #tpu.memory_space<vmem>>, %arg9: memref<8x1xf32, #tpu.memory_space<vmem>>) attributes {dimension_semantics = [#tpu.dimension_semantics<parallel>, #tpu.dimension_semantics<arbitrary>], iteration_bounds = array<i64: 2, 1>, scalar_prefetch = 0 : i64, scratch_operands = 1 : i64, tpu.core_type = #tpu.core_type<tc>, window_params = [{transform_indices = @transform_0, window_bounds = array<i64: 1, 4, 256>}, {pipeline_mode = #tpu.pipeline_mode<synchronous>, transform_indices = @transform_1, window_bounds = array<i64: 8, 4>}, {pipeline_mode = #tpu.pipeline_mode<synchronous>, transform_indices = @transform_2, window_bounds = array<i64: 8, 1>}, {pipeline_mode = #tpu.pipeline_mode<synchronous>, transform_indices = @transform_3, window_bounds = array<i64: 8, 10>}, {pipeline_mode = #tpu.pipeline_mode<synchronous>, transform_indices = @transform_4, window_bounds = array<i64: 1, 10>}, {transform_indices = @transform_5, window_bounds = array<i64: 1, 8, 256>}, {transform_indices = @transform_6, window_bounds = array<i64: 1, 1, 10>}]} {
    %c0_i32 = arith.constant 0 : i32
    %0 = arith.cmpi eq, %arg1, %c0_i32 : i32
    %1 = arith.extui %0 : i1 to i32
    %c0_i32_0 = arith.constant 0 : i32
    %2 = arith.cmpi ne, %1, %c0_i32_0 : i32
    scf.if %2 {
      %cst_17 = arith.constant 0.000000e+00 : f32
      %45 = vector.broadcast %cst_17 : f32 to vector<8x1xf32>
      %c0_18 = arith.constant 0 : index
      %c0_19 = arith.constant 0 : index
      %46 = vector.load %arg9[%c0_18, %c0_19] : memref<8x1xf32, #tpu.memory_space<vmem>>, vector<8x1xf32>
      tpu.vector_store %arg9[%c0_18, %c0_19], %45 {strides = array<i32>} : memref<8x1xf32, #tpu.memory_space<vmem>>, vector<8x1xf32>,
    } else {
    }
    %c0 = arith.constant 0 : index
    %c0_1 = arith.constant 0 : index
    %c0_2 = arith.constant 0 : index
    %3 = vector.load %arg2[%c0, %c0_1, %c0_2] : memref<1x4x256xf32, #tpu.memory_space<vmem>>, vector<1x4x256xf32>
    %4 = vector.shape_cast %3 : vector<1x4x256xf32> to vector<4x256xf32>
    %c0_3 = arith.constant 0 : index
    %c0_4 = arith.constant 0 : index
    %5 = vector.load %arg3[%c0_3, %c0_4] : memref<8x4xf32, #tpu.memory_space<vmem>>, vector<8x4xf32>
    %6 = vector.extract_strided_slice %5 {offsets = [0, 0], sizes = [8, 1], strides = [1, 1]} : vector<8x4xf32> to vector<8x1xf32>
    %7 = vector.extract_strided_slice %4 {offsets = [0, 0], sizes = [1, 256], strides = [1, 1]} : vector<4x256xf32> to vector<1x256xf32>
    %8 = vector.broadcast %6 : vector<8x1xf32> to vector<8x256xf32>
    %9 = vector.broadcast %7 : vector<1x256xf32> to vector<8x256xf32>
    %10 = arith.mulf %8, %9 : vector<8x256xf32>
    %11 = vector.extract_strided_slice %5 {offsets = [0, 1], sizes = [8, 1], strides = [1, 1]} : vector<8x4xf32> to vector<8x1xf32>
    %12 = vector.extract_strided_slice %4 {offsets = [1, 0], sizes = [1, 256], strides = [1, 1]} : vector<4x256xf32> to vector<1x256xf32>
    %13 = vector.broadcast %11 : vector<8x1xf32> to vector<8x256xf32>
    %14 = vector.broadcast %12 : vector<1x256xf32> to vector<8x256xf32>
    %15 = arith.mulf %13, %14 : vector<8x256xf32>
    %16 = arith.addf %10, %15 : vector<8x256xf32>
    %17 = vector.extract_strided_slice %5 {offsets = [0, 2], sizes = [8, 1], strides = [1, 1]} : vector<8x4xf32> to vector<8x1xf32>
    %18 = vector.extract_strided_slice %4 {offsets = [2, 0], sizes = [1, 256], strides = [1, 1]} : vector<4x256xf32> to vector<1x256xf32>
    %19 = vector.broadcast %17 : vector<8x1xf32> to vector<8x256xf32>
    %20 = vector.broadcast %18 : vector<1x256xf32> to vector<8x256xf32>
    %21 = arith.mulf %19, %20 : vector<8x256xf32>
    %22 = arith.addf %16, %21 : vector<8x256xf32>
    %23 = vector.extract_strided_slice %5 {offsets = [0, 3], sizes = [8, 1], strides = [1, 1]} : vector<8x4xf32> to vector<8x1xf32>
    %24 = vector.extract_strided_slice %4 {offsets = [3, 0], sizes = [1, 256], strides = [1, 1]} : vector<4x256xf32> to vector<1x256xf32>
    %25 = vector.broadcast %23 : vector<8x1xf32> to vector<8x256xf32>
    %26 = vector.broadcast %24 : vector<1x256xf32> to vector<8x256xf32>
    %27 = arith.mulf %25, %26 : vector<8x256xf32>
    %28 = arith.addf %22, %27 : vector<8x256xf32>
    %c0_5 = arith.constant 0 : index
    %c0_6 = arith.constant 0 : index
    %29 = vector.load %arg4[%c0_5, %c0_6] : memref<8x1xf32, #tpu.memory_space<vmem>>, vector<8x1xf32>
    %30 = vector.broadcast %29 : vector<8x1xf32> to vector<8x256xf32>
    %31 = arith.addf %28, %30 : vector<8x256xf32>
    %cst = arith.constant 0.000000e+00 : f32
    %32 = vector.broadcast %cst : f32 to vector<8x256xf32>
    %33 = arith.maximumf %31, %32 : vector<8x256xf32>
    %c0_7 = arith.constant 0 : index
    %c0_8 = arith.constant 0 : index
    %c0_9 = arith.constant 0 : index
    %34 = vector.load %arg7[%c0_7, %c0_8, %c0_9] : memref<1x8x256xf32, #tpu.memory_space<vmem>>, vector<1x8x256xf32>
    %35 = vector.shape_cast %34 : vector<1x8x256xf32> to vector<8x256xf32>
    %36 = vector.shape_cast %33 : vector<8x256xf32> to vector<1x8x256xf32>
    tpu.vector_store %arg7[%c0_7, %c0_8, %c0_9], %36 {strides = array<i32>} : memref<1x8x256xf32, #tpu.memory_space<vmem>>, vector<1x8x256xf32>,
    %c0_10 = arith.constant 0 : index
    %c0_11 = arith.constant 0 : index
    %37 = vector.load %arg9[%c0_10, %c0_11] : memref<8x1xf32, #tpu.memory_space<vmem>>, vector<8x1xf32>
    %cst_12 = arith.constant dense<0.000000e+00> : vector<8xf32>
    %38 = vector.multi_reduction <add>, %33, %cst_12 [1] : vector<8x256xf32> to vector<8xf32>
    %39 = vector.shape_cast %38 : vector<8xf32> to vector<8x1xf32>
    %40 = arith.addf %37, %39 : vector<8x1xf32>
    %c0_13 = arith.constant 0 : index
    %c0_14 = arith.constant 0 : index
    %41 = vector.load %arg9[%c0_13, %c0_14] : memref<8x1xf32, #tpu.memory_space<vmem>>, vector<8x1xf32>
    tpu.vector_store %arg9[%c0_13, %c0_14], %40 {strides = array<i32>} : memref<8x1xf32, #tpu.memory_space<vmem>>, vector<8x1xf32>,
    %c0_i32_15 = arith.constant 0 : i32
    %42 = arith.cmpi eq, %arg1, %c0_i32_15 : i32
    %43 = arith.extui %42 : i1 to i32
    %c0_i32_16 = arith.constant 0 : i32
    %44 = arith.cmpi ne, %43, %c0_i32_16 : i32
    scf.if %44 {
      %c0_17 = arith.constant 0 : index
      %c0_18 = arith.constant 0 : index
      %45 = vector.load %arg9[%c0_17, %c0_18] : memref<8x1xf32, #tpu.memory_space<vmem>>, vector<8x1xf32>
      %cst_19 = arith.constant 3.906250e-03 : f32
      %46 = vector.broadcast %cst_19 : f32 to vector<8x1xf32>
      %47 = arith.mulf %45, %46 : vector<8x1xf32>
      %c0_20 = arith.constant 0 : index
      %c0_21 = arith.constant 0 : index
      %48 = vector.load %arg5[%c0_20, %c0_21] : memref<8x10xf32, #tpu.memory_space<vmem>>, vector<8x10xf32>
      %49 = vector.broadcast %47 : vector<8x1xf32> to vector<8x10xf32>
      %50 = arith.mulf %49, %48 : vector<8x10xf32>
      %cst_22 = arith.constant dense<0.000000e+00> : vector<10xf32>
      %51 = vector.multi_reduction <add>, %50, %cst_22 [0] : vector<8x10xf32> to vector<10xf32>
      %52 = vector.shape_cast %51 : vector<10xf32> to vector<1x10xf32>
      %c0_23 = arith.constant 0 : index
      %c0_24 = arith.constant 0 : index
      %53 = vector.load %arg6[%c0_23, %c0_24] : memref<1x10xf32, #tpu.memory_space<vmem>>, vector<1x10xf32>
      %54 = arith.addf %52, %53 : vector<1x10xf32>
      %c0_25 = arith.constant 0 : index
      %c0_26 = arith.constant 0 : index
      %c0_27 = arith.constant 0 : index
      %55 = vector.load %arg8[%c0_25, %c0_26, %c0_27] : memref<1x1x10xf32, #tpu.memory_space<vmem>>, vector<1x1x10xf32>
      %56 = vector.shape_cast %55 : vector<1x1x10xf32> to vector<1x10xf32>
      %57 = vector.shape_cast %54 : vector<1x10xf32> to vector<1x1x10xf32>
      tpu.vector_store %arg8[%c0_25, %c0_26, %c0_27], %57 {strides = array<i32>} : memref<1x1x10xf32, #tpu.memory_space<vmem>>, vector<1x1x10xf32>,
    } else {
    }
    return
  }
  func.func @transform_0(%arg0: i32, %arg1: i32) -> (i32, i32, i32) {
    %c0_i32 = arith.constant 0 : i32
    %c0_i32_0 = arith.constant 0 : i32
    return %arg0, %c0_i32, %arg1 : i32, i32, i32
  }
  func.func @transform_1(%arg0: i32, %arg1: i32) -> (i32, i32) {
    %c0_i32 = arith.constant 0 : i32
    %c0_i32_0 = arith.constant 0 : i32
    %c0_i32_1 = arith.constant 0 : i32
    return %c0_i32, %c0_i32_0 : i32, i32
  }
  func.func @transform_2(%arg0: i32, %arg1: i32) -> (i32, i32) {
    %c0_i32 = arith.constant 0 : i32
    %c0_i32_0 = arith.constant 0 : i32
    %c0_i32_1 = arith.constant 0 : i32
    return %c0_i32, %c0_i32_0 : i32, i32
  }
  func.func @transform_3(%arg0: i32, %arg1: i32) -> (i32, i32) {
    %c0_i32 = arith.constant 0 : i32
    %c0_i32_0 = arith.constant 0 : i32
    %c0_i32_1 = arith.constant 0 : i32
    return %c0_i32, %c0_i32_0 : i32, i32
  }
  func.func @transform_4(%arg0: i32, %arg1: i32) -> (i32, i32) {
    %c0_i32 = arith.constant 0 : i32
    %c0_i32_0 = arith.constant 0 : i32
    %c0_i32_1 = arith.constant 0 : i32
    return %c0_i32, %c0_i32_0 : i32, i32
  }
  func.func @transform_5(%arg0: i32, %arg1: i32) -> (i32, i32, i32) {
    %c0_i32 = arith.constant 0 : i32
    %c0_i32_0 = arith.constant 0 : i32
    return %arg0, %c0_i32, %arg1 : i32, i32, i32
  }
  func.func @transform_6(%arg0: i32, %arg1: i32) -> (i32, i32, i32) {
    %c0_i32 = arith.constant 0 : i32
    %c0_i32_0 = arith.constant 0 : i32
    %c0_i32_1 = arith.constant 0 : i32
    return %arg0, %c0_i32, %c0_i32_0 : i32, i32, i32
  }
}

</mosaic_0001>

<bundles_post_ra>
// kernel: tpu_custom_call.1
= control target key start
LH: loop header
LB: loop body
LE: loop exit
PB: predicated region body
PF: predicated region fallthrough
CT: control target
= control target key end

     0   :  { %12 = vsyncpa [#allocation4], 0  ;;  %s956_s0 = inlined_call_operand.vmem [shape: f32[2,4,256], index: 0, kind: input, shape index: {}]   ;;  %s957_s1 = inlined_call_operand.vmem [shape: f32[8,4], index: 1, kind: input, shape index: {}]   ;;  %s958_s2 = inlined_call_operand.vmem [shape: f32[8,1], index: 2, kind: input, shape index: {}]   ;;  %s959_s3 = inlined_call_operand.vmem [shape: f32[8,10], index: 3, kind: input, shape index: {}]   ;;  %s960_s4 = inlined_call_operand.vmem [shape: f32[1,10], index: 4, kind: input, shape index: {}]   ;;  %s961_s5 = inlined_call_operand.hbm [shape: f32[2,8,256], index: 5, kind: output, shape index: {0}]   ;;  %s962_s6 = inlined_call_operand.hbm [shape: f32[2,1,10], index: 6, kind: output, shape index: {1}]  }
   0x1   :  { %14 = vsyncpa [#allocation4 + $0x1], 0 }
   0x2   :  { %15 = vsyncpa [#allocation6], 0 }
   0x3   :  { %17 = vsyncpa [#allocation6 + $0x1], 0  ;;  %s821_s21 = smov 0   ;;  %s823_s22 = smov 0  }
   0x4   :  { %s825_s23 = smov 0   ;;  %s827_s24 = smov 0  }
   0x5   :  { %s829_s25 = smov 0   ;;  %s831_s26 = smov 0  }
   0x6 LB: > { %s584_s27 = sadd.s32 4294967295, %s777_s26   ;;  %s585_s28 = sadd.s32 4294967294, %s777_s26   ;;  %s777_s26 = sphi %s831_s26, %s23_s26   ;;  %s773_s25 = sphi %s829_s25, %s969_s25   ;;  %s769_s24 = sphi %s827_s24, %s968_s24   ;;  %s765_s23 = sphi %s825_s23, %s967_s23   ;;  %s761_s22 = sphi %s823_s22, %s966_s22   ;;  %s757_s21 = sphi %s821_s21, %s965_s21  }
   0x7   : > { %s35_s29 = sadd.s32 1, %s773_s25  ;;  %s156_s30 = sadd.s32 1, %s765_s23 }
   0x8   : > { %p37_p0 = scmp.ge.s32.totalorder %s35_s29, 2  ;;  %p166_p1 = scmp.ne.s32.totalorder %s765_s23, %s761_s22 }
   0x9   : > { %p167_p2 = scmp.eq.s32.totalorder %s584_s27, 1  ;;  %p172_p3 = scmp.ne.s32.totalorder %s761_s22, %s757_s21 }
   0xa   : > { %s971_s29 = smov (%p37_p0, %s35_s29), 0  ;;  %p173_p5 = scmp.eq.s32.totalorder %s585_s28, 1 }
   0xb   : > { %p861_p4 = por %p167_p2, %p166_p1  ;;  %s151_s8 = ssub.s32 %s773_s25, %s971_s29 }
   0xc   : > { %p588_p6 = scmp.ge.s32.totalorder %s777_s26, 1  ;;  %p154_p7 = scmp.eq.s32.totalorder %s151_s8, 0 }
   0xd   : > { %p868_p8 = por %p173_p5, %p172_p3  ;;  %p242_p9 = scmp.lt.s32.totalorder %s777_s26, 3 }
   0xe   : > { %s874_s10 = scalar_select %p154_p7, %s765_s23, %s156_s30  }
   0xf   : > { %p243_p10 = pnand %p588_p6, %p242_p9 }
  0x10   : > { %p281_p11 = scmp.lt.s32.totalorder (!%p243_p10), %s769_s24, 1  ;;  %s889_s20 = sand.u32 (!%p243_p10), 1, %s761_s22  }
  0x11   : > { %246 = sbr.rel (%p243_p10) target bundleno = 471 (0x1d7), region = 40  ;;  %s589_s27 = sshll.u32 (!%p243_p10), %s889_s20, 4 }
  0x12   : > { %s273_s28 = scalar_lea.vmem (!%p243_p10), [#allocation3], %s589_s27  ;;  %s599_s30 = sshll.u32 (!%p243_p10), %s769_s24, 8 }
  0x13   : > { %s465_s12 = scalar_lea.hbm (!%p243_p10), %s961_s5, %s599_s30  ;;  %s467_s13 = sshll.u32 (!%p243_p10), %s273_s28, 4  ;;  %s468_s13 = int_to_ptr.vmem [resolvable:$true] %s467_s13 }
  0x14   : > { %s447_s14 = scalar_lea.sflag (!%p243_p10), [#allocation4], %s889_s20 }
  0x16   : > { %v298_v0 = vld [vmem:[%s957_s1] sm:$0xff]  ;;  %v779_v1 = vmov 0   ;;  %v780_v2 = vmov 2   ;;  %v781_v3 = vmov 1   ;;  %v782_v4 = vmov 3   ;;  %s282_s15 = scalar_select %p281_p11, %s769_s24, 1 }
  0x17   : > { %665 = vset.pattern.permute.xlu0 %v779_v1  ;;  %667 = vset.pattern.permute.xlu1 %v780_v2  ;;  %v403_v5 = vld [vmem:[%s958_s2] sm:$0xff]  ;;  %vm295_vm0 = vcmask 7168   ;;  %v783_v6 = vmov 0.0   ;;  %v305_v7 = vlaneseq }
  0x18   : > { %301 = vperm.xlu0 %665, %v298_v0   ;;  %352 = vperm.xlu1 %667, %v298_v0   ;;  %296 = vst.msk [vmem:[#allocation2] sm:$0xff] %vm295_vm0, %v783_v6  ;;  %s598_s16 = sshll.u32 %s282_s15, 3  ;;  %s671_s15 = scalar_lea.vmem %s468_s13, 256 }
  0x19   : > { %v306_v8 = vshrl.u32 %v305_v7, 7  ;;  %s288_s19 = scalar_lea.vmem %s956_s0, %s598_s16  ;;  %p672_p12 = scmp.ne.s32.totalorder %s468_s13, %s671_s15 }
  0x1a   : > { %v297_v13 = vld [vmem:[%s288_s19] sm:$0xff]  ;;  %s784_s16 = smov [#allocation3]  }
  0x1b   : > { %v307_v9 = vsub.s32 0, %v306_v8  ;;  %v311_v10 = vsub.s32 4, %v306_v8  ;;  %v331_v11 = vsub.s32 1, %v306_v8  ;;  %v335_v12 = vsub.s32 5, %v306_v8  ;;  %p673_p13 = pnand %p672_p12, %p861_p4  ;;  %s675_s17 = sshll.u32 %s784_s16, 4  ;;  %s676_s17 = int_to_ptr.vmem [resolvable:$false] %s675_s17 }
  0x1c   : > { %666 = vset.pattern.permute.xlu0 %v781_v3  ;;  %668 = vset.pattern.permute.xlu1 %v782_v4  ;;  %v357_v14 = vsub.s32 2, %v306_v8  ;;  %v361_v15 = vsub.s32 6, %v306_v8  ;;  %v383_v16 = vsub.s32 3, %v306_v8  ;;  %v387_v17 = vsub.s32 7, %v306_v8  ;;  %s677_s18 = scalar_lea.vmem %s676_s17, 512  ;;  %p678_p1 = scmp.lt.s32.totalorder %s468_s13, %s676_s17 }
  0x1d   : > { %326 = vperm.xlu0 %666, %v298_v0   ;;  %378 = vperm.xlu1 %668, %v298_v0   ;;  %v308_v18 = vrot.slane %v297_v13, %v307_v9  ;;  %v312_v19 = vrot.slane %v297_v13, %v311_v10  ;;  %v332_v20 = vrot.slane %v297_v13, %v331_v11  ;;  %p674_p0 = pneg %p673_p13  ;;  %p679_p2 = scmp.lt.s32.totalorder %s677_s18, %s671_s15 }
  0x1e   : > { %v336_v21 = vrot.slane %v297_v13, %v335_v12  ;;  %v358_v22 = vrot.slane %v297_v13, %v357_v14  ;;  %v362_v23 = vrot.slane %v297_v13, %v361_v15  ;;  %v384_v26 = vrot.slane %v297_v13, %v383_v16 }
  0x1f   : > { %v388_v27 = vrot.slane %v297_v13, %v387_v17  ;;  %v318_v28 = vrot.slane %v308_v18, %v307_v9  ;;  %v322_v29 = vrot.slane %v312_v19, %v307_v9  ;;  %v342_v30 = vrot.slane %v332_v20, %v331_v11  ;;  %v415_v58 = vld [vmem:[#allocation2] sm:$0xff]  ;;  %p680_p3 = por %p679_p2, %p678_p1 }
  0x20   : > { %v346_v31 = vrot.slane %v336_v21, %v331_v11  ;;  %v368_v32 = vrot.slane %v358_v22, %v357_v14  ;;  %v372_v33 = vrot.slane %v362_v23, %v357_v14  ;;  %v394_v34 = vrot.slane %v384_v26, %v383_v16 }
  0x21   : > { %669 = vset.pattern.permute.xlu1 %v779_v1  ;;  %670 = vset.pattern.permute.xlu0 %v779_v1  ;;  %v398_v35 = vrot.slane %v388_v27, %v383_v16  ;;  %p681_p5 = pnand %p680_p3, %p674_p0 }
  0x22   : > { %406 = vperm.xlu1 %669, %v403_v5  }
  0x93   : > { %v302_v24 = vpop.permute.xlu0 %301  ;;  %v353_v25 = vpop.permute.xlu1 %352 }
  0x94   : > { %v323_v38 = vmul.f32 %v318_v28, %v302_v24  ;;  %v324_v39 = vmul.f32 %v322_v29, %v302_v24  ;;  %v373_v42 = vmul.f32 %v368_v32, %v353_v25  ;;  %v374_v43 = vmul.f32 %v372_v33, %v353_v25 }
  0x98   : > { %v327_v36 = vpop.permute.xlu0 %326  ;;  %v379_v37 = vpop.permute.xlu1 %378 }
  0x99   : > { %v347_v40 = vmul.f32 %v342_v30, %v327_v36  ;;  %v348_v41 = vmul.f32 %v346_v31, %v327_v36  ;;  %v399_v46 = vmul.f32 %v394_v34, %v379_v37  ;;  %v400_v47 = vmul.f32 %v398_v35, %v379_v37 }
  0x9b   : > { %v349_v44 = vadd.f32 %v347_v40, %v323_v38  ;;  %v350_v45 = vadd.f32 %v348_v41, %v324_v39 }
  0x9d   : > { %v375_v48 = vadd.f32 %v373_v42, %v349_v44  ;;  %v376_v49 = vadd.f32 %v374_v43, %v350_v45  ;;  %v407_v50 = vpop.permute.xlu1 %406 }
  0x9f   : > { %v401_v51 = vadd.f32 %v399_v46, %v375_v48  ;;  %v402_v52 = vadd.f32 %v400_v47, %v376_v49 }
  0xa1   : > { %v409_v53 = vadd.f32 %v407_v50, %v401_v51  ;;  %v410_v54 = vadd.f32 %v407_v50, %v402_v52 }
  0xa3   : > { %v411_v55 = vmax.f32 %v409_v53, 0.0  ;;  %v412_v56 = vmax.f32 %v410_v54, 0.0 }
  0xa5   : > { %413 = vst [vmem:[%s273_s28] sm:$0xff] %v411_v55  ;;  %414 = vst [vmem:[%s273_s28 + $0x8] sm:$0xff] %v412_v56  ;;  %v416_v57 = vadd.f32 %v412_v56, %v411_v55 }
  0xa7   : > { %417 = vadd.xlane.f32.xlu0 %v416_v57 }
 0x130   : > { %v418_v59 = vpop.xlane.xlu0 %417 }
 0x131   : > { %v419_v60 = vadd.f32 %v418_v59, %v415_v58 }
 0x133   : > { %421 = vst.msk [vmem:[#allocation2] sm:$0xff] %vm295_vm0, %v419_v60 }
 0x13a   : > { %v425_v61 = vld [vmem:[#allocation2] sm:$0xff] }
 0x13b   : > { %v426_v62 = vmul.f32 0.00390625, %v425_v61 }
 0x13d   : > { %430 = vperm.xlu1 %669, %v426_v62  }
 0x13e   : > { %684 = shalt.err (!%p681_p5)
}
 0x13f   : > { %s685_s19 = scalar_lea.hbm %s465_s12, 256  ;;  %s689_s30 = scalar_lea.hbm %s961_s5, 512 }
 0x140   : > { %p686_p6 = scmp.ne.s32.totalorder %s465_s12, %s685_s19  ;;  %p690_p10 = scmp.lt.s32.totalorder %s465_s12, %s961_s5 }
 0x141   : > { %p691_p11 = scmp.lt.s32.totalorder %s689_s30, %s685_s19 }
 0x142   : > { %p687_p7 = pnand %p686_p6, %p861_p4 }
 0x143   : > { %p692_p12 = por %p691_p11, %p690_p10 }
 0x144   : > { %p688_p9 = pneg %p687_p7 }
 0x146   : > { %p693_p13 = pnand %p692_p12, %p688_p9 }
 0x148   : > { %696 = shalt.err (!%p693_p13)
}
 0x149   : > { %600 = dma.vmem_to_hbm [thread:$0]  (%p861_p4), %s468_s13, 256, %s465_s12, %s447_s14   ;;  %v427_v63 = vld [vmem:[%s959_s3] sm:$0xff]  ;;  %vm434_vm1 = vcmask 80896   ;;  %vm444_vm2 = vcmask 73728  }
 0x14a   : > { %v442_v8 = vld [vmem:[%s960_s4] sm:$0x1]  ;;  %s595_s12 = sshll.u32 %s769_s24, 4  ;;  %s279_s13 = scalar_lea.vmem [#allocation5], %s889_s20 }
 0x14b   : > { %s480_s14 = sshll.u32 %s279_s13, 4  ;;  %s478_s28 = scalar_lea.hbm %s962_s6, %s595_s12  ;;  %s481_s14 = int_to_ptr.vmem [resolvable:$true] %s480_s14 }
 0x14c   : > { %s452_s30 = scalar_lea.sflag [#allocation6], %s889_s20  ;;  %s697_s8 = scalar_lea.vmem %s481_s14, 16 }
 0x14d   : > { %p698_p0 = scmp.ne.s32.totalorder %s481_s14, %s697_s8  ;;  %s785_s11 = smov [#allocation5]  }
 0x14e   : > { %s701_s15 = sshll.u32 %s785_s11, 4  ;;  %s702_s15 = int_to_ptr.vmem [resolvable:$false] %s701_s15 }
 0x14f   : > { %p699_p1 = pnand %p698_p0, %p861_p4  ;;  %s703_s24 = scalar_lea.vmem %s702_s15, 32 }
 0x150   : > { %p704_p3 = scmp.lt.s32.totalorder %s481_s14, %s702_s15  ;;  %p705_p5 = scmp.lt.s32.totalorder %s703_s24, %s697_s8 }
 0x151   : > { %p700_p2 = pneg %p699_p1 }
 0x152   : > { %p706_p6 = por %p705_p5, %p704_p3 }
 0x154   : > { %p707_p7 = pnand %p706_p6, %p700_p2 }
 0x1b8   : > { %v431_v0 = vpop.permute.xlu1 %430 }
 0x1b9   : > { %v433_v1 = vmul.f32 %v431_v0, %v427_v63 }
 0x1bb   : > { %v435_v2 = vsel %vm434_vm1, %v433_v1, 0.0 }
 0x1bc   : > { %v436_v3 = vrot.slane %v435_v2, 4 }
 0x1be   : > { %v437_v4 = vadd.f32 %v436_v3, %v435_v2 }
 0x1c0   : > { %v438_v5 = vrot.slane %v437_v4, 2 }
 0x1c2   : > { %v439_v6 = vadd.f32 %v438_v5, %v437_v4 }
 0x1c4   : > { %v440_v7 = vrot.slane %v439_v6, 1 }
 0x1c6   : > { %v441_v9 = vadd.f32 %v440_v7, %v439_v6 }
 0x1c8   : > { %v443_v10 = vadd.f32 %v442_v8, %v441_v9 }
 0x1ca   : > { %445 = vst.msk [vmem:[%s279_s13] sm:$0x1] %vm444_vm2, %v443_v10 }
 0x1cb   : > { %710 = shalt.err (!%p707_p7)
}
 0x1cc   : > { %s711_s16 = scalar_lea.hbm %s478_s28, 16  ;;  %s715_s18 = scalar_lea.hbm %s962_s6, 32 }
 0x1cd   : > { %p712_p9 = scmp.ne.s32.totalorder %s478_s28, %s711_s16  ;;  %p716_p12 = scmp.lt.s32.totalorder %s478_s28, %s962_s6 }
 0x1ce   : > { %p717_p13 = scmp.lt.s32.totalorder %s715_s18, %s711_s16 }
 0x1cf   : > { %p713_p10 = pnand %p712_p9, %p861_p4 }
 0x1d0   : > { %p718_p0 = por %p717_p13, %p716_p12 }
 0x1d1   : > { %p714_p11 = pneg %p713_p10 }
 0x1d3   : > { %p719_p1 = pnand %p718_p0, %p714_p11 }
 0x1d5   : > { %722 = shalt.err (!%p719_p1)
}
 0x1d6   : > { %601 = dma.vmem_to_hbm [thread:$0]  (%p861_p4), %s481_s14, 16, %s478_s28, %s452_s30  }
 0x1d7 PF: > { %p611_p2 = scmp.ge.s32.totalorder %s777_s26, 2  ;;  %s492_s19 = sand.u32 1, %s757_s21  }
 0x1d8   : > { %s493_s27 = scalar_lea.sflag [#allocation4], %s492_s19 }
 0x1d9   : > { %p605_p3 = pnand %p611_p2, %p868_p8 }
 0x1db   : > { %p606_p5 = pneg %p605_p3 }
 0x1dd   : > { %748 = dma.done.wait (%p606_p5), %s493_s27, 256  }
 0x1de   : > { %750 = vsyncadd (%p606_p5), %s493_s27, 4294967040  ;;  %s502_s8 = scalar_lea.sflag [#allocation6], %s492_s19 }
 0x1df   : > { %752 = dma.done.wait (%p606_p5), %s502_s8, 16  }
 0x1e0   : > { %754 = vsyncadd (%p606_p5), %s502_s8, 4294967280  ;;  %s23_s26 = sadd.s32 1, %s777_s26   ;;  %s965_s21 = smov %s761_s22 }
 0x1e1   : > { %p20_p6 = scmp.ge.s32.totalorder %s23_s26, 4   ;;  %s966_s22 = smov %s765_s23 }
 0x1e2   : > { %s967_s23 = smov %s874_s10  ;;  %s968_s24 = smov %s773_s25 }
 0x1e3   : > { %s969_s25 = smov %s971_s29  ;;  %22 = sbr.rel (!%p20_p6) target bundleno = 6 (0x6), region = 100 }
 0x1e8   :  { %506 = vsyncpa [#allocation4], 1 }
 0x1e9   :  { %508 = vsyncpa [#allocation4 + $0x1], 1 }
 0x1ea   :  { %509 = vsyncpa [#allocation6], 1 }
 0x1eb   :  { %511 = vsyncpa [#allocation6 + $0x1], 1 }

</bundles_post_ra>
